<compile_context>
chip_gen: v7x
topology: tpu7x:2x2x1
jax: 0.10.0
libtpu: 0.0.40
codegen_flags: <defaults>
</compile_context>

<pallas_src>
import functools

import jax
import jax.numpy as jnp
import numpy as np
from jax import lax
from jax.experimental import pallas as pl
from jax.experimental.pallas import tpu as pltpu


def _bahdanau_kernel(enc_ref,      # VMEM (Bb, T, E)  encoder outputs (compute dtype)
                     q_ref,        # VMEM (Bb, A) f32 pre-projected query
                     len_ref,      # VMEM (Bb, 1) i32 valid lengths
                     wm_ref,       # VMEM (E, A)      memory_layer weight, input-major
                     wp_ref,       # VMEM (1, A) f32  project_layer weight row
                     bp_ref,       # SMEM (1, 1) f32  project_layer bias
                     ctx_ref,      # VMEM (Bb, E) f32 out: context
                     scores_ref,   # VMEM (Bb, T) f32 out: attention weights
                     *, t_chunk):
    bb, T, E = enc_ref.shape
    A = wm_ref.shape[1]

    # keys = memory_layer(encoder_out): one dense MXU matmul over all Bb*T rows,
    # f32 accumulation.  (The merge/split reshape is free when T % 8 == 0.)
    enc = enc_ref[...]                                         # (Bb, T, E) compute dtype
    keys = jnp.dot(enc.reshape(bb * T, E), wm_ref[...],
                   preferred_element_type=jnp.float32).reshape(bb, T, A)

    # tanh(keys + processed_query); the query projection was hoisted to the wrapper.
    h = jnp.tanh(keys + q_ref[...][:, None, :])                # (Bb, T, A) f32

    # project_layer (N=1 matmul) as VPU multiply + lane reduce (keeps MXU free).
    score = jnp.sum(h * wp_ref[...], axis=-1) + bp_ref[0, 0]   # (Bb, T) f32

    # Mask padded timesteps and softmax along T (lane axis).
    t_ids = lax.broadcasted_iota(jnp.int32, (bb, T), 1)        # (Bb, T)
    length = jnp.maximum(len_ref[...], 1)                      # (Bb, 1) guard len == 0 / garbage rows
    masked = jnp.where(t_ids >= length, -jnp.inf, score)       # (Bb, T)
    m = jnp.max(masked, axis=-1, keepdims=True)
    p = jnp.exp(masked - m)                                    # padded positions -> exactly 0
    denom = jnp.sum(p, axis=-1, keepdims=True)
    # EUP approximate reciprocal + 2 Newton steps (f32-accurate, no VPU divide).
    r = pl.reciprocal(denom, approx=True)
    r = r * (2.0 - denom * r)
    r = r * (2.0 - denom * r)
    alpha = p * r                                              # (Bb, T) f32

    # context = sum_t alpha_t * enc_t : VPU multiply + sublane reduce, chunked over T
    # so only one (Bb, t_chunk, E) f32 product is live at a time.
    def chunk_ctx(a_c, e_c):
        return jnp.sum(a_c[:, :, None] * e_c.astype(jnp.float32), axis=1)

    if t_chunk >= T:
        ctx = chunk_ctx(alpha, enc)                            # single chunk
    else:
        n_full = T // t_chunk
        rem = T - n_full * t_chunk

        def body(c, acc):
            t0 = pl.multiple_of(c * t_chunk, t_chunk)
            a_c = lax.dynamic_slice(alpha, (0, t0), (bb, t_chunk))
            e_c = enc_ref[:, pl.ds(t0, t_chunk), :]
            return acc + chunk_ctx(a_c, e_c)

        ctx = lax.fori_loop(0, n_full, body, jnp.zeros((bb, E), jnp.float32))
        if rem:
            ctx = ctx + chunk_ctx(alpha[:, n_full * t_chunk:],
                                  enc[:, n_full * t_chunk:, :])

    ctx_ref[...] = ctx.astype(ctx_ref.dtype)
    scores_ref[...] = alpha.astype(scores_ref.dtype)


def _vmem_capacity_bytes():
    """Per-core VMEM capacity (generation-aware); conservative fallback = 64 MiB (v7x)."""
    try:
        info = pltpu.get_tpu_info()
        cap = getattr(info, "vmem_capacity_bytes", None)
        if cap:
            return int(cap)
    except Exception:
        pass
    return 64 * 2**20


def _vmem_budget_bytes(bb, T, E, A, esize, t_chunk):
    """Double-buffered streamed blocks + resident weights + f32 kernel intermediates."""
    stream_in = bb * (T * E * esize + A * 4 + 4)               # enc + q + lengths
    stream_out = bb * (E * 4 + T * 4)                          # ctx + scores
    weights = E * A * esize + A * 4                            # Wm + wp
    inter = (bb * T * A * 4 * 2                                # keys + h (f32)
             + bb * T * 4 * 4                                  # score/masked/p/alpha (f32)
             + bb * t_chunk * E * 4                            # ctx chunk product (f32)
             + bb * T * E * esize)                             # loaded enc value
    return 2 * (stream_in + stream_out) + 2 * weights + inter


@functools.partial(jax.jit, static_argnames=("b_blk", "compute_dtype"))
def bahdanau_attention(encoder_out, lengths, decoder_out, wm_t, wq_t, wp, bp,
                       *, b_blk=None, compute_dtype=jnp.bfloat16):
    """Bahdanau attention forward.

    encoder_out: (B, T, E) f32, lengths: (B,) int, decoder_out: (B, D) f32.
    Weights are passed input-major (transposed from the PyTorch layout):
      wm_t: (E, A), wq_t: (D, A), wp: (A, 1), bp: (1, 1).
    Returns (context (B, E) f32, att_scores (B, T) f32).

    compute_dtype controls only the STREAMED operands (encoder_out, Wm); the matmul
    accumulates in f32 and all post-matmul math is f32.  Default bf16 halves HBM
    traffic of the dominant tensor (the kernel is memory-bound on v5e/v6e/v7x);
    pass compute_dtype=jnp.float32 for bit-faithful f32 semantics.
    """
    B, T, E = encoder_out.shape
    A = wm_t.shape[-1]
    esize = jnp.dtype(compute_dtype).itemsize
    t_chunk = min(T, 512)                                      # ctx-reduction chunk (sublanes)

    # Hoisted query projection: one dense XLA matmul (f32) instead of B tiny MXU ops.
    q = jnp.dot(decoder_out.astype(jnp.float32), wq_t.astype(jnp.float32),
                preferred_element_type=jnp.float32)            # (B, A)

    # Streamed big operands in compute_dtype (bf16 default); small tensors stay f32.
    enc_in = encoder_out.astype(compute_dtype)
    wm_in = wm_t.astype(compute_dtype)
    lengths2d = lengths.astype(jnp.int32).reshape(B, 1)
    wp_row = wp.reshape(1, A).astype(jnp.float32)
    bp2d = bp.reshape(1, 1).astype(jnp.float32)

    # ---- batch-block selection: bytes-driven, generation-aware --------------------
    cap = _vmem_capacity_bytes()
    if b_blk is None:
        row_bytes = max(1, T * E * esize)
        bb = max(1, (4 * 2**20) // row_bytes)                  # ~4 MiB of streamed enc / step
        if B <= 8 or bb >= B:
            bb = B
        else:
            bb = max(8, (bb // 8) * 8)                         # sublane-legal block (mult of 8)
        # v7x: keep >= 2 grid steps so both TensorCores get work (cheap on 1-TC chips).
        if bb == B and B >= 16:
            bb = ((pl.cdiv(B, 2) + 7) // 8) * 8
        # Shrink until double-buffered blocks + f32 intermediates fit this chip's VMEM.
        min_bb = B if B <= 8 else 8
        while bb > min_bb and _vmem_budget_bytes(bb, T, E, A, esize, t_chunk) > int(0.80 * cap):
            bb = max(min_bb, ((bb // 2 + 7) // 8) * 8)
        b_blk = bb

    nb = pl.cdiv(B, b_blk)
    # NOTE: no padding of the (B, T, E) tensor.  If B % b_blk != 0 the last batch block
    # is a Pallas partial block: garbage rows stay row-local (length clamp + masked
    # output stores) and are never written back.

    grid_spec = pltpu.PrefetchScalarGridSpec(
        num_scalar_prefetch=0,
        grid=(nb,),
        in_specs=[
            pl.BlockSpec((b_blk, T, E), lambda b: (b, 0, 0)),    # encoder_out (streamed)
            pl.BlockSpec((b_blk, A), lambda b: (b, 0)),          # processed query
            pl.BlockSpec((b_blk, 1), lambda b: (b, 0)),          # lengths
            pl.BlockSpec((E, A), lambda b: (0, 0)),              # Wm^T (resident)
            pl.BlockSpec((1, A), lambda b: (0, 0)),              # wp row (resident)
            pl.BlockSpec(memory_space=pltpu.MemorySpace.SMEM),   # bp scalar
        ],
        out_specs=[
            pl.BlockSpec((b_blk, E), lambda b: (b, 0)),          # context
            pl.BlockSpec((b_blk, T), lambda b: (b, 0)),          # att_scores
        ],
    )

    # Advisory cost estimate so XLA can overlap neighbours (e.g. the q matmul / cast).
    cost = pl.CostEstimate(
        flops=2 * B * T * E * A + 2 * B * T * A + 2 * B * T * E + 6 * B * T,
        transcendentals=B * T * A + B * T,
        bytes_accessed=(esize * (B * T * E + E * A)
                        + 4 * (B * A + B + A + 1 + B * E + B * T)),
    )

    budget = _vmem_budget_bytes(b_blk, T, E, A, esize, t_chunk)
    vmem_limit = int(min(int(0.85 * cap), max(32 * 2**20, budget + 4 * 2**20)))

    ctx, scores = pl.pallas_call(
        functools.partial(_bahdanau_kernel, t_chunk=t_chunk),
        grid_spec=grid_spec,
        out_shape=(
            jax.ShapeDtypeStruct((B, E), jnp.float32),
            jax.ShapeDtypeStruct((B, T), jnp.float32),
        ),
        compiler_params=pltpu.CompilerParams(
            dimension_semantics=("parallel",),   # shard batch grid across TCs (v7x)
            vmem_limit_bytes=vmem_limit,
        ),
        cost_estimate=cost,
    )(enc_in, q, lengths2d, wm_in, wp_row, bp2d)

    return ctx, scores


def _reference(encoder_out, lengths, decoder_out, wm_t, wq_t, wp, bp):
    keys = encoder_out @ wm_t                               # (B, T, A)
    q = decoder_out @ wq_t                                  # (B, A)
    score = jnp.tanh(keys + q[:, None, :]) @ wp + bp[0, 0]  # (B, T, 1)
    T = encoder_out.shape[1]
    mask = jnp.arange(T)[None, :] >= lengths[:, None]       # (B, T) True = pad
    score = jnp.where(mask[..., None], -jnp.inf, score)
    alpha = jax.nn.softmax(score, axis=1)                   # (B, T, 1)
    ctx = jnp.sum(alpha * encoder_out, axis=1)              # (B, E)
    return ctx, alpha[..., 0]


def _make_case(key, B, T, E, D, A, lens):
    k1, k2, k3, k4, k5, k6 = jax.random.split(key, 6)
    encoder_out = jax.random.normal(k1, (B, T, E), jnp.float32)
    decoder_out = jax.random.normal(k2, (B, D), jnp.float32)
    lengths = jnp.asarray(lens, dtype=jnp.int32)
    # nn.Linear(encoder_dim, attention_dim, bias=False): weight (A, E) -> pass W^T (E, A)
    wm_t = 0.1 * jax.random.normal(k3, (E, A), jnp.float32)
    # nn.Linear(decoder_dim, attention_dim, bias=False): weight (A, D) -> pass W^T (D, A)
    wq_t = 0.1 * jax.random.normal(k4, (D, A), jnp.float32)
    # nn.Linear(attention_dim, 1): weight (1, A) -> pass W^T (A, 1), bias (1, 1)
    wp = 0.1 * jax.random.normal(k5, (A, 1), jnp.float32)
    bp = 0.1 * jax.random.normal(k6, (1, 1), jnp.float32)
    return (encoder_out, lengths, decoder_out, wm_t, wq_t, wp, bp)


if __name__ == "__main__":
    key = jax.random.PRNGKey(0)
    k1, k2 = jax.random.split(key)

    # ---- case 1: module-sized shapes, default (bf16-streamed) kernel ----------------
    args = _make_case(k1, B=2, T=8, E=16, D=32, A=32, lens=[5, 8])
    ctx_bf, sc_bf = bahdanau_attention(*args)
    jax.block_until_ready((ctx_bf, sc_bf))
    ctx_ref, sc_ref = _reference(*args)
    np.testing.assert_allclose(np.asarray(ctx_bf), np.asarray(ctx_ref), rtol=2e-2, atol=2e-2)
    np.testing.assert_allclose(np.asarray(sc_bf), np.asarray(sc_ref), rtol=2e-2, atol=2e-2)
    # masked (padded) positions must get exactly zero attention, even with bf16 streaming
    assert float(np.abs(np.asarray(sc_bf)[0, 5:]).max()) == 0.0

    # ---- case 2: same inputs, full-f32 streaming (bit-faithful to the f32 module) ---
    ctx_f32, sc_f32 = bahdanau_attention(*args, compute_dtype=jnp.float32)
    jax.block_until_ready((ctx_f32, sc_f32))
    np.testing.assert_allclose(np.asarray(ctx_f32), np.asarray(ctx_ref), rtol=1e-5, atol=1e-5)
    np.testing.assert_allclose(np.asarray(sc_f32), np.asarray(sc_ref), rtol=1e-5, atol=1e-5)

    # ---- case 3: ragged last batch block (B=20, b_blk=8) — no wrapper-side padding ---
    lens3 = [int(v) for v in np.random.RandomState(0).randint(1, 17, size=20)]
    args3 = _make_case(k2, B=20, T=16, E=24, D=40, A=48, lens=lens3)
    ctx3, sc3 = bahdanau_attention(*args3, b_blk=8, compute_dtype=jnp.float32)
    jax.block_until_ready((ctx3, sc3))
    ctx3_ref, sc3_ref = _reference(*args3)
    np.testing.assert_allclose(np.asarray(ctx3), np.asarray(ctx3_ref), rtol=1e-5, atol=1e-5)
    np.testing.assert_allclose(np.asarray(sc3), np.asarray(sc3_ref), rtol=1e-5, atol=1e-5)

    print("KERNEL_OK")
</pallas_src>

<mosaic_0001>
module attributes {stable_mosaic.version = 11 : i64} {
  func.func @_bahdanau_kernel(%arg0: i32, %arg1: memref<2x8x16xbf16, #tpu.memory_space<vmem>>, %arg2: memref<2x32xf32, #tpu.memory_space<vmem>>, %arg3: memref<2x1xi32, #tpu.memory_space<vmem>>, %arg4: memref<16x32xbf16, #tpu.memory_space<vmem>>, %arg5: memref<1x32xf32, #tpu.memory_space<vmem>>, %arg6: memref<1x1xf32, #tpu.memory_space<smem>>, %arg7: memref<2x16xf32, #tpu.memory_space<vmem>>, %arg8: memref<2x8xf32, #tpu.memory_space<vmem>>) attributes {dimension_semantics = [#tpu.dimension_semantics<parallel>], iteration_bounds = array<i64: 1>, scalar_prefetch = 0 : i64, scratch_operands = 0 : i64, tpu.core_type = #tpu.core_type<tc>, window_params = [{transform_indices = @transform_0, window_bounds = array<i64: 2, 8, 16>}, {transform_indices = @transform_1, window_bounds = array<i64: 2, 32>}, {transform_indices = @transform_2, window_bounds = array<i64: 2, 1>}, {pipeline_mode = #tpu.pipeline_mode<synchronous>, transform_indices = @transform_3, window_bounds = array<i64: 16, 32>}, {pipeline_mode = #tpu.pipeline_mode<synchronous>, transform_indices = @transform_4, window_bounds = array<i64: 1, 32>}, {transform_indices = @transform_5, window_bounds = array<i64: 1, 1>}, {transform_indices = @transform_6, window_bounds = array<i64: 2, 16>}, {transform_indices = @transform_7, window_bounds = array<i64: 2, 8>}]} {
    %c0 = arith.constant 0 : index
    %c0_0 = arith.constant 0 : index
    %c0_1 = arith.constant 0 : index
    %0 = vector.load %arg1[%c0, %c0_0, %c0_1] : memref<2x8x16xbf16, #tpu.memory_space<vmem>>, vector<2x8x16xbf16>
    %1 = vector.shape_cast %0 : vector<2x8x16xbf16> to vector<16x16xbf16>
    %c0_2 = arith.constant 0 : index
    %c0_3 = arith.constant 0 : index
    %2 = vector.load %arg4[%c0_2, %c0_3] : memref<16x32xbf16, #tpu.memory_space<vmem>>, vector<16x32xbf16>
    %cst = arith.constant dense<0.000000e+00> : vector<16x32xf32>
    %3 = tpu.matmul %1, %2, %cst {dimension_numbers = #tpu.dot_dimension_numbers<[1], [0], [0], [1], [0, 0, 1, 1], [], []>} : vector<16x16xbf16>, vector<16x32xbf16>, vector<16x32xf32> -> vector<16x32xf32>
    %4 = vector.shape_cast %3 : vector<16x32xf32> to vector<2x8x32xf32>
    %c0_4 = arith.constant 0 : index
    %c0_5 = arith.constant 0 : index
    %5 = vector.load %arg2[%c0_4, %c0_5] : memref<2x32xf32, #tpu.memory_space<vmem>>, vector<2x32xf32>
    %6 = vector.shape_cast %5 : vector<2x32xf32> to vector<2x1x32xf32>
    %7 = vector.broadcast %6 : vector<2x1x32xf32> to vector<2x8x32xf32>
    %8 = arith.addf %4, %7 : vector<2x8x32xf32>
    %9 = math.tanh %8 : vector<2x8x32xf32>
    %c0_6 = arith.constant 0 : index
    %c0_7 = arith.constant 0 : index
    %10 = vector.load %arg5[%c0_6, %c0_7] : memref<1x32xf32, #tpu.memory_space<vmem>>, vector<1x32xf32>
    %11 = vector.shape_cast %10 : vector<1x32xf32> to vector<1x1x32xf32>
    %12 = vector.broadcast %11 : vector<1x1x32xf32> to vector<2x8x32xf32>
    %13 = arith.mulf %9, %12 : vector<2x8x32xf32>
    %cst_8 = arith.constant dense<0.000000e+00> : vector<2x8xf32>
    %14 = vector.multi_reduction <add>, %13, %cst_8 [2] : vector<2x8x32xf32> to vector<2x8xf32>
    %c0_9 = arith.constant 0 : index
    %c0_10 = arith.constant 0 : index
    %15 = memref.load %arg6[%c0_9, %c0_10] : memref<1x1xf32, #tpu.memory_space<smem>>
    %16 = vector.broadcast %15 : f32 to vector<2x8xf32>
    %17 = arith.addf %14, %16 : vector<2x8xf32>
    %18 = tpu.iota {dimensions = array<i32: 1>} : vector<2x8xi32>
    %c0_11 = arith.constant 0 : index
    %c0_12 = arith.constant 0 : index
    %19 = vector.load %arg3[%c0_11, %c0_12] : memref<2x1xi32, #tpu.memory_space<vmem>>, vector<2x1xi32>
    %c1_i32 = arith.constant 1 : i32
    %20 = vector.broadcast %c1_i32 : i32 to vector<2x1xi32>
    %21 = arith.maxsi %19, %20 : vector<2x1xi32>
    %22 = vector.broadcast %21 : vector<2x1xi32> to vector<2x8xi32>
    %23 = arith.cmpi sge, %18, %22 : vector<2x8xi32>
    %cst_13 = arith.constant 0xFF800000 : f32
    %24 = vector.broadcast %cst_13 : f32 to vector<2x8xf32>
    %25 = arith.select %23, %24, %17 : vector<2x8xi1>, vector<2x8xf32>
    %cst_14 = arith.constant dense<0xFF800000> : vector<2xf32>
    %26 = vector.multi_reduction <maximumf>, %25, %cst_14 [1] : vector<2x8xf32> to vector<2xf32>
    %27 = vector.shape_cast %26 : vector<2xf32> to vector<2x1xf32>
    %28 = vector.broadcast %27 : vector<2x1xf32> to vector<2x8xf32>
    %29 = arith.subf %25, %28 : vector<2x8xf32>
    %30 = math.exp %29 : vector<2x8xf32>
    %cst_15 = arith.constant dense<0.000000e+00> : vector<2xf32>
    %31 = vector.multi_reduction <add>, %30, %cst_15 [1] : vector<2x8xf32> to vector<2xf32>
    %32 = vector.shape_cast %31 : vector<2xf32> to vector<2x1xf32>
    %33 = tpu.reciprocal %32 {approx = true} : vector<2x1xf32> -> vector<2x1xf32>
    %34 = arith.mulf %32, %33 : vector<2x1xf32>
    %cst_16 = arith.constant 2.000000e+00 : f32
    %35 = vector.broadcast %cst_16 : f32 to vector<2x1xf32>
    %36 = arith.subf %35, %34 : vector<2x1xf32>
    %37 = arith.mulf %33, %36 : vector<2x1xf32>
    %38 = arith.mulf %32, %37 : vector<2x1xf32>
    %cst_17 = arith.constant 2.000000e+00 : f32
    %39 = vector.broadcast %cst_17 : f32 to vector<2x1xf32>
    %40 = arith.subf %39, %38 : vector<2x1xf32>
    %41 = arith.mulf %37, %40 : vector<2x1xf32>
    %42 = vector.broadcast %41 : vector<2x1xf32> to vector<2x8xf32>
    %43 = arith.mulf %30, %42 : vector<2x8xf32>
    %44 = vector.shape_cast %43 : vector<2x8xf32> to vector<2x8x1xf32>
    %45 = arith.extf %0 : vector<2x8x16xbf16> to vector<2x8x16xf32>
    %46 = vector.broadcast %44 : vector<2x8x1xf32> to vector<2x8x16xf32>
    %47 = arith.mulf %46, %45 : vector<2x8x16xf32>
    %cst_18 = arith.constant dense<0.000000e+00> : vector<2x16xf32>
    %48 = vector.multi_reduction <add>, %47, %cst_18 [1] : vector<2x8x16xf32> to vector<2x16xf32>
    %c0_19 = arith.constant 0 : index
    %c0_20 = arith.constant 0 : index
    %49 = vector.load %arg7[%c0_19, %c0_20] : memref<2x16xf32, #tpu.memory_space<vmem>>, vector<2x16xf32>
    tpu.vector_store %arg7[%c0_19, %c0_20], %48 {strides = array<i32>} : memref<2x16xf32, #tpu.memory_space<vmem>>, vector<2x16xf32>,
    %c0_21 = arith.constant 0 : index
    %c0_22 = arith.constant 0 : index
    %50 = vector.load %arg8[%c0_21, %c0_22] : memref<2x8xf32, #tpu.memory_space<vmem>>, vector<2x8xf32>
    tpu.vector_store %arg8[%c0_21, %c0_22], %43 {strides = array<i32>} : memref<2x8xf32, #tpu.memory_space<vmem>>, vector<2x8xf32>,
    return
  }
  func.func @transform_0(%arg0: i32) -> (i32, i32, i32) {
    %c0_i32 = arith.constant 0 : i32
    %c0_i32_0 = arith.constant 0 : i32
    %c0_i32_1 = arith.constant 0 : i32
    return %arg0, %c0_i32, %c0_i32_0 : i32, i32, i32
  }
  func.func @transform_1(%arg0: i32) -> (i32, i32) {
    %c0_i32 = arith.constant 0 : i32
    %c0_i32_0 = arith.constant 0 : i32
    return %arg0, %c0_i32 : i32, i32
  }
  func.func @transform_2(%arg0: i32) -> (i32, i32) {
    %c0_i32 = arith.constant 0 : i32
    %c0_i32_0 = arith.constant 0 : i32
    return %arg0, %c0_i32 : i32, i32
  }
  func.func @transform_3(%arg0: i32) -> (i32, i32) {
    %c0_i32 = arith.constant 0 : i32
    %c0_i32_0 = arith.constant 0 : i32
    %c0_i32_1 = arith.constant 0 : i32
    return %c0_i32, %c0_i32_0 : i32, i32
  }
  func.func @transform_4(%arg0: i32) -> (i32, i32) {
    %c0_i32 = arith.constant 0 : i32
    %c0_i32_0 = arith.constant 0 : i32
    %c0_i32_1 = arith.constant 0 : i32
    return %c0_i32, %c0_i32_0 : i32, i32
  }
  func.func @transform_5(%arg0: i32) -> (i32, i32) {
    %c0_i32 = arith.constant 0 : i32
    %c0_i32_0 = arith.constant 0 : i32
    %c0_i32_1 = arith.constant 0 : i32
    return %c0_i32, %c0_i32_0 : i32, i32
  }
  func.func @transform_6(%arg0: i32) -> (i32, i32) {
    %c0_i32 = arith.constant 0 : i32
    %c0_i32_0 = arith.constant 0 : i32
    return %arg0, %c0_i32 : i32, i32
  }
  func.func @transform_7(%arg0: i32) -> (i32, i32) {
    %c0_i32 = arith.constant 0 : i32
    %c0_i32_0 = arith.constant 0 : i32
    return %arg0, %c0_i32 : i32, i32
  }
}

</mosaic_0001>

<bundles_post_ra>
// kernel: bahdanau_attention.1
= control target key start
LH: loop header
LB: loop body
LE: loop exit
PB: predicated region body
PF: predicated region fallthrough
CT: control target
= control target key end

     0   :  { %14 = vsyncpa [#allocation4], 0  ;;  %v335_v1 = vmov 0.0   ;;  %s442_s0 = inlined_call_operand.vmem [shape: bf16[2,8,16], index: 0, kind: input, shape index: {}]   ;;  %s443_s1 = inlined_call_operand.vmem [shape: f32[2,32], index: 1, kind: input, shape index: {}]   ;;  %s444_s2 = inlined_call_operand.vmem [shape: s32[2,1], index: 2, kind: input, shape index: {}]   ;;  %s445_s3 = inlined_call_operand.vmem [shape: bf16[16,32], index: 3, kind: input, shape index: {}]   ;;  %s446_s4 = inlined_call_operand.vmem [shape: f32[1,32], index: 4, kind: input, shape index: {}]   ;;  %s447_s5 = inlined_call_operand.<no memory space> [shape: f32[1,1], index: 5, kind: input, shape index: {}]   ;;  %s448_s6 = inlined_call_operand.hbm [shape: f32[2,16], index: 6, kind: output, shape index: {0}]   ;;  %s449_s7 = inlined_call_operand.hbm [shape: f32[2,8], index: 7, kind: output, shape index: {1}]  }
   0x1   :  { %v276_v0 = vld [vmem:[%s445_s3] sm:$0xff]   ;;  %262 = vmatprep.subr.bf16.mxu0 %v335_v1 }
   0x2   :  { %v387_v2 = vld [vmem:[%s442_s0] sm:$0xff]  }
   0x3   :  { %15 = vsyncpa [#allocation6], 0  ;;  %263 = vmatpush3.bf16.msra.mxu0 %v276_v0  ;;  %vm336_vm0 = vmmov 0   ;;  %vm44_vm1 = vcmask 130048   ;;  %v149_v3 = vld [vmem:[%s444_s2] sm:$0x3]  ;;  %v102_v8 = vlaneseq  ;;  %v144_v33 = vstv %s447_s5 }
   0x4   :  { %264 = vmatprep.mubr.msk.bf16.mxu0 %vm336_vm0, %v335_v1  ;;  %v337_v4 = vmov 0   ;;  %vm150_vm2 = vcmp.gt.s32.totalorder %v149_v3, 1  ;;  %v338_v6 = vmov 1966171168   ;;  %v259_v25 = vld [vmem:[%s446_s4] ss:$0 sm:$0xff] }
   0x5   :  { %274 = vset.pattern.permute.xlu1 %v337_v4  ;;  %275 = vset.pattern.permute.xlu0 %v337_v4  ;;  %v151_v5 = vsel %vm150_vm2, %v149_v3, 1  ;;  %v100_v7 = vunpack.c.l.s4 %v338_v6  ;;  %v394_v10 = vshrl.u32 %v102_v8, 7  ;;  %v258_v11 = vld.sshfl [vmem:[%s443_s1] sm:$0x11 pattern:$0x75316420] }
   0x6   :  { %265 = vmatmul.mubr.msk.bf16.vlgmr.msra.gmra.mrb[0].mxu0 %vm44_vm1, %v387_v2  ;;  %153 = vperm.xlu1 %274, %v151_v5   ;;  %v98_v13 = vcombine.high %v258_v11, %v258_v11  ;;  %vm136_vm3 = vcmask 261120   ;;  %v148_v32 = vand.u32 127, %v102_v8  ;;  %vm166_vm4 = vcmask 1041409   ;;  %s339_s4 = smov [#allocation5]  }
   0x7   :  { %v101_v9 = vunpack.c.0.s8 %v100_v7  ;;  %v115_v15 = vsub.s32 0, %v394_v10  ;;  %vm170_vm6 = vcmask 58368   ;;  %v197_v60 = vsub.s32 1, %v394_v10  ;;  %s243_s5 = sshll.u32 %s339_s4, 4  ;;  %s244_s5 = int_to_ptr.vmem [resolvable:$true] %s243_s5 }
   0x8   :  { %v160_v35 = vsub.s32 %v148_v32, %v394_v10  ;;  %s287_s9 = scalar_lea.vmem %s244_s5, 32  ;;  %p292_p1 = scmp.lt.s32.totalorder %s244_s5, %s244_s5 }
   0x9   :  { %v104_v12 = vsub.s32 %v101_v9, %v394_v10  ;;  %p288_p0 = scmp.ne.s32.totalorder %s244_s5, %s287_s9  ;;  %p293_p2 = scmp.lt.s32.totalorder %s287_s9, %s287_s9 }
   0xb   :  { %v105_v14 = vrot.slane %v258_v11, %v104_v12  ;;  %v112_v16 = vrot.slane %v98_v13, %v104_v12  ;;  %p294_p3 = por %p293_p2, %p292_p1 }
   0xd   :  { %v116_v17 = vrot.slane %v105_v14, %v115_v15  ;;  %v120_v18 = vrot.slane %v112_v16, %v115_v15  ;;  %p295_p4 = pnand %p294_p3, %p288_p0 }
  0x85   :  { %v154_v38 = vpop.permute.xlu1 %153 }
  0x86   :  { %vm155_vm5 = vcmp.ge.s32.totalorder %v148_v32, %v154_v38 }
  0xd9   :  { %v82_v19 = vpop.f32.mrb[0].mxu0 }
  0xda   :  { %v123_v20 = vadd.f32 %v116_v17, %v82_v19  ;;  %v266_v21 = vpop.f32.mrb[1].mxu0 }
  0xdb   :  { %v85_v22 = vpop.f32.mrb[2].mxu0 }
  0xdc   :  { %279 = vtanh.f32 %v123_v20  ;;  %v124_v23 = vadd.f32 %v120_v18, %v85_v22  ;;  %v267_v24 = vpop.f32.mrb[3].mxu0 }
  0xde   :  { %281 = vtanh.f32 %v124_v23 }
  0xe6   :  { %v280_v26 = vpop.eup %279 }
  0xe7   :  { %v134_v27 = vmul.f32 %v280_v26, %v259_v25 }
  0xe8   :  { %v282_v28 = vpop.eup %281 }
  0xe9   :  { %v137_v29 = vsel %vm136_vm3, %v134_v27, 0.0  ;;  %v135_v30 = vmul.f32 %v282_v28, %v259_v25 }
  0xea   :  { %138 = vadd.xlane.f32.xlu0 %v137_v29 }
  0xeb   :  { %v140_v31 = vsel %vm136_vm3, %v135_v30, 0.0 }
  0xee   :  { %141 = vadd.xlane.f32.xlu0 %v140_v31 }
 0x177   :  { %v139_v34 = vpop.xlane.xlu0 %138 }
 0x178   :  { %v145_v36 = vadd.f32 %v144_v33, %v139_v34 }
 0x17a   :  { %v161_v40 = vrot.slane %v145_v36, %v160_v35 }
 0x17b   :  { %v142_v37 = vpop.xlane.xlu0 %141 }
 0x17c   :  { %v146_v39 = vadd.f32 %v144_v33, %v142_v37 }
 0x17e   :  { %v165_v41 = vrot.slane %v146_v39, %v160_v35 }
 0x180   :  { %v167_v42 = vsel %vm166_vm4, %v165_v41, %v161_v40 }
 0x181   :  { %v169_v43 = vsel %vm155_vm5, -inf, %v167_v42 }
 0x182   :  { %v171_v44 = vsel %vm170_vm6, %v169_v43, -inf }
 0x183   :  { %172 = vmax.xlane.f32.xlu1 %v171_v44 }
 0x210   :  { %v173_v45 = vpop.xlane.xlu1 %172 }
 0x211   :  { %v174_v46 = vsub.f32 %v169_v43, %v173_v45 }
 0x213   :  { %v175_v47 = vmul.f32 1.442695, %v174_v46 }
 0x215   :  { %283 = vpow2.f32 %v175_v47 }
 0x21f   :  { %v284_v48 = vpop.eup %283 }
 0x220   :  { %v177_v49 = vsel %vm170_vm6, %v284_v48, 0.0 }
 0x221   :  { %178 = vadd.xlane.f32.xlu0 %v177_v49 }
 0x2ae   :  { %v179_v50 = vpop.xlane.xlu0 %178 }
 0x2af   :  { %285 = vrcp.f32 %v179_v50 }
 0x2b9   :  { %v286_v51 = vpop.eup %285 }
 0x2ba   :  { %v181_v52 = vmul.f32 %v286_v51, %v179_v50 }
 0x2bc   :  { %v182_v53 = vsub.f32 2.0, %v181_v52 }
 0x2be   :  { %v183_v54 = vmul.f32 %v286_v51, %v182_v53 }
 0x2c0   :  { %v184_v55 = vmul.f32 %v183_v54, %v179_v50 }
 0x2c2   :  { %v185_v56 = vsub.f32 2.0, %v184_v55 }
 0x2c4   :  { %v186_v57 = vmul.f32 %v185_v56, %v183_v54 }
 0x2c6   :  { %v187_v58 = vmul.f32 %v284_v48, %v186_v57 }
 0x2c8   :  { %v191_v59 = vrot.slane %v187_v58, %v115_v15  ;;  %226 = vst.msk [vmem:[#allocation5] sm:$0x3] %vm170_vm6, %v187_v58  ;;  %v198_v61 = vrot.slane %v187_v58, %v197_v60 }
 0x2ca   :  { %193 = vbcast.lane.b32.xlu0 %v191_v59, 256 }
 0x2ce   :  { %200 = vbcast.lane.b32.xlu0 %v198_v61, 256 }
 0x2cf   :  { %298 = shalt.err (!%p295_p4)
}
 0x2d0   :  { %s299_s12 = scalar_lea.hbm %s449_s7, 32 }
 0x2d1   :  { %p300_p5 = scmp.ne.s32.totalorder %s449_s7, %s299_s12  ;;  %p303_p6 = scmp.lt.u32.totalorder %s299_s12, %s449_s7 }
 0x2d3   :  { %p305_p7 = pnand %p303_p6, %p300_p5 }
 0x2d5   :  { %308 = shalt.err (!%p305_p7)
}
 0x2d6   :  { %246 = dma.vmem_to_hbm [thread:$0]  %s244_s5, 32, %s449_s7, [#allocation6]   ;;  %v202_v62 = vunpack.c.l.bf16 %v387_v2  ;;  %v203_v1 = vunpack.c.h.bf16 %v387_v2  ;;  %vm224_vm7 = vcmask 123904  }
 0x2d7   :  { %s340_s7 = smov [#allocation3]  }
 0x2d8   :  { %s233_s19 = sshll.u32 %s340_s7, 4  ;;  %s234_s19 = int_to_ptr.vmem [resolvable:$true] %s233_s19 }
 0x2d9   :  { %s309_s20 = scalar_lea.vmem %s234_s19, 32  ;;  %p314_p9 = scmp.lt.s32.totalorder %s234_s19, %s234_s19 }
 0x2da   :  { %p310_p8 = scmp.ne.s32.totalorder %s234_s19, %s309_s20  ;;  %p315_p10 = scmp.lt.s32.totalorder %s309_s20, %s309_s20 }
 0x2dc   :  { %p316_p11 = por %p315_p10, %p314_p9 }
 0x2de   :  { %p317_p12 = pnand %p316_p11, %p310_p8 }
 0x33c   :  { %v194_v63 = vpop.permute.xlu0 %193 }
 0x33d   :  { %v204_v0 = vmul.f32 %v202_v62, %v194_v63 }
 0x33f   :  { %v206_v3 = vsel %vm44_vm1, %v204_v0, 0.0 }
 0x340   :  { %v207_v4 = vrot.slane %v206_v3, 4  ;;  %v201_v5 = vpop.permute.xlu0 %200 }
 0x341   :  { %v205_v6 = vmul.f32 %v203_v1, %v201_v5 }
 0x342   :  { %v208_v7 = vadd.f32 %v207_v4, %v206_v3 }
 0x343   :  { %v213_v8 = vsel %vm44_vm1, %v205_v6, 0.0 }
 0x344   :  { %v209_v9 = vrot.slane %v208_v7, 2  ;;  %v214_v10 = vrot.slane %v213_v8, 4 }
 0x346   :  { %v210_v11 = vadd.f32 %v209_v9, %v208_v7  ;;  %v215_v12 = vadd.f32 %v214_v10, %v213_v8 }
 0x348   :  { %v216_v13 = vrot.slane %v215_v12, 2  ;;  %v211_v14 = vrot.slane %v210_v11, 1 }
 0x34a   :  { %v217_v15 = vadd.f32 %v216_v13, %v215_v12  ;;  %v212_v17 = vadd.f32 %v211_v14, %v210_v11 }
 0x34c   :  { %v218_v16 = vrot.slane %v217_v15, 1 }
 0x34e   :  { %v219_v2 = vadd.f32 %v218_v16, %v217_v15 }
 0x350   :  { %v222_v18 = vsel %vm166_vm4, %v219_v2, %v212_v17 }
 0x351   :  { %225 = vst.msk [vmem:[#allocation3] sm:$0x3] %vm224_vm7, %v222_v18 }
 0x352   :  { %320 = shalt.err (!%p317_p12)
}
 0x353   :  { %s321_s23 = scalar_lea.hbm %s448_s6, 32 }
 0x354   :  { %p322_p13 = scmp.ne.s32.totalorder %s448_s6, %s321_s23  ;;  %p325_p0 = scmp.lt.u32.totalorder %s321_s23, %s448_s6 }
 0x356   :  { %p327_p1 = pnand %p325_p0, %p322_p13 }
 0x358   :  { %330 = shalt.err (!%p327_p1)
}
 0x359   :  { %236 = dma.vmem_to_hbm [thread:$0]  %s234_s19, 32, %s448_s6, [#allocation4]  }
 0x35a   :  { %331 = dma.done.wait [#allocation4], 32  }
 0x35b   :  { %332 = vsyncadd [#allocation4], 4294967264 }
 0x35c   :  { %333 = dma.done.wait [#allocation6], 32  }
 0x35d   :  { %334 = vsyncadd [#allocation6], 4294967264 }
 0x35e   :  { %253 = vsyncpa [#allocation4], 1 }
 0x35f   :  { %254 = vsyncpa [#allocation6], 1 }

</bundles_post_ra>
